<compile_context>
chip_gen: v7x
topology: tpu7x:2x2x1
jax: 0.10.0
libtpu: 0.0.40
codegen_flags: <defaults>
</compile_context>

<pallas_src>
import jax
import jax.numpy as jnp
from jax.experimental import pallas as pl
from jax.experimental.pallas import tpu as pltpu


def _huber_kernel(x_ref, o_ref):
    x = x_ref[...]
    square = x * x * 0.5
    linear = x - 0.5
    # square * (1 - mask) + linear * mask  ==  where(x > 1, linear, square)
    o_ref[...] = jnp.where(x > 1.0, linear, square)


_TARGET_BLOCK_BYTES = 4 * 1024 * 1024   # 4 MiB blocks: ~86% of HBM roofline on v6e,
                                        # amortizes per-step cost on v7x's faster HBM.
_VMEM_LIMIT_BYTES = 40 * 1024 * 1024    # > 2 arrays x 2 pipeline buffers x 4 MiB,
                                        # well under v7x's 64 MiB physical VMEM.
_SMALL_BYTES = 1 * 1024 * 1024          # gridless single-block path only below this.
_LANE_CHOICES = (2048, 1024, 512, 256, 128)
_RAGGED_CHUNK = 128 * 1024              # elements per (1, chunk) block on the ragged
                                        # path; kept modest since a (1, N) row-vector
                                        # block may pad sublanes in VMEM.
# TODO(synk): widen _RAGGED_CHUNK if the (1, N) row-vector VMEM layout is
# confirmed dense (lane-only tiling) on the target chip generation.


def _full_block_call(x2d):
    """Single gridless full-array block (tiny inputs only)."""
    shape = x2d.shape
    return pl.pallas_call(
        _huber_kernel,
        out_shape=jax.ShapeDtypeStruct(shape, x2d.dtype),
        in_specs=[pl.BlockSpec(shape, lambda: (0, 0))],
        out_specs=pl.BlockSpec(shape, lambda: (0, 0)),
    )(x2d)


def _gridded_call(x2d, block_shape, index_map, grid_len):
    """1-D parallel grid of large blocks, double-buffered by BlockSpec."""
    return pl.pallas_call(
        _huber_kernel,
        out_shape=jax.ShapeDtypeStruct(x2d.shape, x2d.dtype),
        grid=(grid_len,),
        in_specs=[pl.BlockSpec(block_shape, index_map)],
        out_specs=pl.BlockSpec(block_shape, index_map),
        compiler_params=pltpu.CompilerParams(
            dimension_semantics=("parallel",),
            vmem_limit_bytes=_VMEM_LIMIT_BYTES,
        ),
    )(x2d)


@jax.jit
def huber_loss(x: jax.Array) -> jax.Array:
    """Elementwise Huber loss (as defined by the PyTorch module) via Pallas."""
    orig_shape = x.shape
    dtype = x.dtype
    total = x.size
    if total == 0:
        return x

    itemsize = jnp.dtype(dtype).itemsize
    flat = jnp.ravel(x)                       # free for a contiguous array
    small = total * itemsize <= _SMALL_BYTES

    if total % 128 == 0:
        # Lane-aligned: pick the widest lane count that divides total while
        # keeping rows >= 8 (sublane density).
        lanes = 128
        for cand in _LANE_CHOICES:
            if total % cand == 0 and total // cand >= 8:
                lanes = cand
                break
        rows = total // lanes
        x2d = flat.reshape(rows, lanes)

        if small:
            out2d = _full_block_call(x2d)
        else:
            # Keep block bytes ~constant regardless of lane width / dtype.
            min_rows = 8 * max(1, 4 // itemsize)   # f32:8, bf16:16, int8/fp8:32
            block_rows = max(min_rows, _TARGET_BLOCK_BYTES // (lanes * itemsize))
            if block_rows >= rows:
                block_rows = rows                  # full-extent dim: always legal
            out2d = _gridded_call(
                x2d,
                (block_rows, lanes),
                lambda i: (i, 0),
                pl.cdiv(rows, block_rows),
            )
    else:
        # Ragged element count: view as a (1, total) row vector and let Pallas's
        # partial edge-block handling mask the tail of the last grid step
        # in-kernel.  No host-side pad / slice passes -> one HBM read + one write.
        x2d = flat.reshape(1, total)
        if small:
            out2d = _full_block_call(x2d)
        else:
            out2d = _gridded_call(
                x2d,
                (1, _RAGGED_CHUNK),
                lambda i: (0, i),
                pl.cdiv(total, _RAGGED_CHUNK),
            )

    return out2d.reshape(orig_shape)


def huber_loss_ref(x: jax.Array) -> jax.Array:
    square = x ** 2 * 0.5
    linear = x - 0.5
    mask = (x > 1).astype(x.dtype)
    return square * (1.0 - mask) + linear * mask


if __name__ == "__main__":
    key = jax.random.PRNGKey(0)
    k1, k2, k3 = jax.random.split(key, 3)

    # Primary: small NCHW-shaped input, consistent with DQN-style usage.
    x_main = jax.random.normal(k1, (2, 4, 16, 16), dtype=jnp.float32) * 2.0
    # Ragged element count (105, not a multiple of 128): no-pad / no-slice path.
    x_ragged = jax.random.normal(k2, (3, 5, 7), dtype=jnp.float32) * 2.0
    # Larger lane-aligned input (16 MiB): exercises the 4 MiB-block gridded path.
    x_grid = jax.random.normal(k3, (1024, 4096), dtype=jnp.float32) * 2.0

    ok = True
    for xi in (x_main, x_ragged, x_grid):
        out = jax.block_until_ready(huber_loss(xi))
        ref = huber_loss_ref(xi)
        ok &= (out.shape == xi.shape) and (out.dtype == xi.dtype)
        ok &= bool(jnp.allclose(out, ref, atol=1e-6, rtol=1e-6))
    assert ok, "mismatch vs reference"

    print("KERNEL_OK")
</pallas_src>

<mosaic_0001>
module attributes {stable_mosaic.version = 11 : i64} {
  func.func @_huber_kernel(%arg0: memref<8x256xf32, #tpu.memory_space<vmem>>, %arg1: memref<8x256xf32, #tpu.memory_space<vmem>>) attributes {dimension_semantics = [], scalar_prefetch = 0 : i64, scratch_operands = 0 : i64, tpu.core_type = #tpu.core_type<tc>} {
    %c0 = arith.constant 0 : index
    %c0_0 = arith.constant 0 : index
    %0 = vector.load %arg0[%c0, %c0_0] : memref<8x256xf32, #tpu.memory_space<vmem>>, vector<8x256xf32>
    %1 = arith.mulf %0, %0 : vector<8x256xf32>
    %cst = arith.constant 5.000000e-01 : f32
    %2 = vector.broadcast %cst : f32 to vector<8x256xf32>
    %3 = arith.mulf %1, %2 : vector<8x256xf32>
    %cst_1 = arith.constant 5.000000e-01 : f32
    %4 = vector.broadcast %cst_1 : f32 to vector<8x256xf32>
    %5 = arith.subf %0, %4 : vector<8x256xf32>
    %cst_2 = arith.constant 1.000000e+00 : f32
    %6 = vector.broadcast %cst_2 : f32 to vector<8x256xf32>
    %7 = arith.cmpf ogt, %0, %6 : vector<8x256xf32>
    %8 = arith.select %7, %5, %3 : vector<8x256xi1>, vector<8x256xf32>
    %c0_3 = arith.constant 0 : index
    %c0_4 = arith.constant 0 : index
    %9 = vector.load %arg1[%c0_3, %c0_4] : memref<8x256xf32, #tpu.memory_space<vmem>>, vector<8x256xf32>
    tpu.vector_store %arg1[%c0_3, %c0_4], %8 {strides = array<i32>} : memref<8x256xf32, #tpu.memory_space<vmem>>, vector<8x256xf32>,
    return
  }
}

</mosaic_0001>

<bundles_post_ra>
// kernel: huber_loss.1
= control target key start
LH: loop header
LB: loop body
LE: loop exit
PB: predicated region body
PF: predicated region fallthrough
CT: control target
= control target key end

     0   :  { %s50_s0 = inlined_call_operand.vmem [shape: f32[8,256], index: 0, kind: input, shape index: {}]   ;;  %s51_s1 = inlined_call_operand.vmem [shape: f32[8,256], index: 1, kind: output, shape index: {}]  }
   0x1   :  { %v8_v0 = vld [vmem:[%s50_s0] sm:$0xff]  ;;  %v9_v1 = vld [vmem:[%s50_s0 + $0x8] sm:$0xff] }
   0x2   :  { %v10_v2 = vmul.f32 %v8_v0, %v8_v0  ;;  %v26_v3 = vadd.f32 -0.5, %v8_v0  ;;  %v11_v4 = vmul.f32 %v9_v1, %v9_v1  ;;  %vm16_vm0 = vcmp.gt.f32.partialorder %v8_v0, 1.0 }
   0x3   :  { %v27_v5 = vadd.f32 -0.5, %v9_v1  ;;  %vm17_vm1 = vcmp.gt.f32.partialorder %v9_v1, 1.0 }
   0x4   :  { %v12_v6 = vmul.f32 0.5, %v10_v2  ;;  %v13_v7 = vmul.f32 0.5, %v11_v4 }
   0x6   :  { %v18_v8 = vsel %vm16_vm0, %v26_v3, %v12_v6  ;;  %v19_v9 = vsel %vm17_vm1, %v27_v5, %v13_v7 }
   0x7   :  { %20 = vst [vmem:[%s51_s1] sm:$0xff] %v18_v8  ;;  %21 = vst [vmem:[%s51_s1 + $0x8] sm:$0xff] %v19_v9 }

</bundles_post_ra>
